<compile_context>
chip_gen: v7x
topology: tpu7x:2x2x1
jax: 0.10.0
libtpu: 0.0.40
codegen_flags: <defaults>
</compile_context>

<pallas_src>
import jax
import jax.numpy as jnp
from jax import lax
from jax.experimental import pallas as pl
from jax.experimental.pallas import tpu as pltpu


def mlp_kernel(x_ref, w1_ref, b1_ref, w2_ref, b2_ref, o_ref):
    # Layer 1: (TM, in) x (hid, in), contracting the last dims -> (TM, hid).
    # Weights are in PyTorch layout; no transpose needed (MXU handles it).
    h = lax.dot_general(
        x_ref[...], w1_ref[...],
        dimension_numbers=(((1,), (1,)), ((), ())),
        preferred_element_type=jnp.float32)
    # f32 epilogue (bias + ReLU) - keep elementwise in f32 (v5e-safe).
    h = jnp.maximum(h + b1_ref[...], 0.0)
    # Layer 2: (TM, hid) x (out_p, hid), contracting the last dims -> (TM, out_p).
    out = lax.dot_general(
        h.astype(w2_ref.dtype), w2_ref[...],
        dimension_numbers=(((1,), (1,)), ((), ())),
        preferred_element_type=jnp.float32)
    o_ref[...] = (out + b2_ref[...]).astype(o_ref.dtype)


def mlp_forward(x, w1, b1, w2, b2, *, block_b=256, lane=128):
    """x: (B, in_dim); w1: (hid_dim, in_dim); b1: (hid_dim,);
       w2: (out_dim, hid_dim); b2: (out_dim,)   -- PyTorch nn.Linear layout.
       Returns (B, out_dim) == w2 @ relu(w1 @ x + b1) + b2."""
    B, in_dim = x.shape
    hid_dim = w1.shape[0]
    out_dim = w2.shape[0]
    out_dtype = x.dtype

    # bf16 operands for the MXU (f32 accumulation happens inside the kernel).
    x_bf = x.astype(jnp.bfloat16)
    w1_bf = w1.astype(jnp.bfloat16)
    w2_bf = w2.astype(jnp.bfloat16)

    # Lane-dense output: pad out-feature dim to a multiple of 128 with zero
    # rows of w2 / zero bias entries; slice the pad off after the call.
    out_p = ((out_dim + lane - 1) // lane) * lane
    if out_p != out_dim:
        w2_bf = jnp.pad(w2_bf, ((0, out_p - out_dim), (0, 0)))
        b2_pad = jnp.pad(b2, ((0, out_p - out_dim),))
    else:
        b2_pad = b2
    b1_2d = b1.reshape(1, hid_dim).astype(jnp.float32)
    b2_2d = b2_pad.reshape(1, out_p).astype(jnp.float32)

    # Batch tiling: weights stay resident in VMEM across batch tiles.
    tm = min(block_b, B)
    n_tiles = pl.cdiv(B, tm)
    b_padded = n_tiles * tm
    if b_padded != B:
        x_bf = jnp.pad(x_bf, ((0, b_padded - B), (0, 0)))

    flops = 2 * b_padded * in_dim * hid_dim + 2 * b_padded * hid_dim * out_p
    bytes_accessed = (
        x_bf.size * 2 + w1_bf.size * 2 + w2_bf.size * 2
        + b1_2d.size * 4 + b2_2d.size * 4
        + b_padded * out_p * jnp.dtype(out_dtype).itemsize)

    out = pl.pallas_call(
        mlp_kernel,
        out_shape=jax.ShapeDtypeStruct((b_padded, out_p), out_dtype),
        grid_spec=pltpu.PrefetchScalarGridSpec(
            num_scalar_prefetch=0,
            grid=(n_tiles,),
            in_specs=[
                # batch-tiled activations
                pl.BlockSpec((tm, in_dim), lambda i: (i, 0)),
                # weights / biases: constant index_map -> resident across tiles
                pl.BlockSpec((hid_dim, in_dim), lambda i: (0, 0)),
                pl.BlockSpec((1, hid_dim), lambda i: (0, 0)),
                pl.BlockSpec((out_p, hid_dim), lambda i: (0, 0)),
                pl.BlockSpec((1, out_p), lambda i: (0, 0)),
            ],
            out_specs=pl.BlockSpec((tm, out_p), lambda i: (i, 0)),
        ),
        compiler_params=pltpu.CompilerParams(
            dimension_semantics=("parallel",)),
        cost_estimate=pl.CostEstimate(
            flops=flops, transcendentals=0, bytes_accessed=bytes_accessed),
    )(x_bf, w1_bf, b1_2d, w2_bf, b2_2d)

    return out[:B, :out_dim]


if __name__ == "__main__":
    # Shapes consistent with the module: in_dim=32, hid_dim=64, batch=8.
    # (out_dim of the constructor is unused by forward(): w2 maps hid -> in.)
    B, in_dim, hid_dim = 8, 32, 64

    key = jax.random.PRNGKey(0)
    kx, kw1, kb1, kw2, kb2 = jax.random.split(key, 5)

    x = jax.random.normal(kx, (B, in_dim), dtype=jnp.float32)
    # Deterministic params (uniform, like PyTorch's default bound 1/sqrt(fan_in)).
    w1 = jax.random.uniform(kw1, (hid_dim, in_dim), jnp.float32,
                            minval=-1.0 / in_dim**0.5, maxval=1.0 / in_dim**0.5)
    b1 = jax.random.uniform(kb1, (hid_dim,), jnp.float32,
                            minval=-1.0 / in_dim**0.5, maxval=1.0 / in_dim**0.5)
    w2 = jax.random.uniform(kw2, (in_dim, hid_dim), jnp.float32,
                            minval=-1.0 / hid_dim**0.5, maxval=1.0 / hid_dim**0.5)
    b2 = jax.random.uniform(kb2, (in_dim,), jnp.float32,
                            minval=-1.0 / hid_dim**0.5, maxval=1.0 / hid_dim**0.5)

    out = mlp_forward(x, w1, b1, w2, b2)
    out = jax.block_until_ready(out)
    assert out.shape == (B, in_dim)

    # Tight check: plain-JAX reference using the SAME math as the kernel
    # (bf16 MXU operands, f32 accumulation, f32 epilogue).
    h_ref = lax.dot_general(x.astype(jnp.bfloat16), w1.astype(jnp.bfloat16),
                            (((1,), (1,)), ((), ())),
                            preferred_element_type=jnp.float32)
    h_ref = jnp.maximum(h_ref + b1, 0.0)
    ref_bf16 = lax.dot_general(h_ref.astype(jnp.bfloat16), w2.astype(jnp.bfloat16),
                               (((1,), (1,)), ((), ())),
                               preferred_element_type=jnp.float32) + b2
    assert jnp.allclose(out, ref_bf16, atol=2e-3, rtol=2e-3)

    # Loose check against the full-f32 PyTorch math (bf16 rounding tolerance).
    ref_f32 = jnp.maximum(x @ w1.T + b1, 0.0) @ w2.T + b2
    assert jnp.allclose(out, ref_f32, atol=5e-2, rtol=5e-2)

    print("KERNEL_OK")
</pallas_src>

<mosaic_0001>
module attributes {stable_mosaic.version = 11 : i64} {
  func.func @mlp_kernel(%arg0: i32, %arg1: memref<8x32xbf16, #tpu.memory_space<vmem>>, %arg2: memref<64x32xbf16, #tpu.memory_space<vmem>>, %arg3: memref<1x64xf32, #tpu.memory_space<vmem>>, %arg4: memref<128x64xbf16, #tpu.memory_space<vmem>>, %arg5: memref<1x128xf32, #tpu.memory_space<vmem>>, %arg6: memref<8x128xf32, #tpu.memory_space<vmem>>) attributes {dimension_semantics = [#tpu.dimension_semantics<parallel>], iteration_bounds = array<i64: 1>, scalar_prefetch = 0 : i64, scratch_operands = 0 : i64, tpu.core_type = #tpu.core_type<tc>, window_params = [{transform_indices = @transform_0, window_bounds = array<i64: 8, 32>}, {pipeline_mode = #tpu.pipeline_mode<synchronous>, transform_indices = @transform_1, window_bounds = array<i64: 64, 32>}, {pipeline_mode = #tpu.pipeline_mode<synchronous>, transform_indices = @transform_2, window_bounds = array<i64: 1, 64>}, {pipeline_mode = #tpu.pipeline_mode<synchronous>, transform_indices = @transform_3, window_bounds = array<i64: 128, 64>}, {pipeline_mode = #tpu.pipeline_mode<synchronous>, transform_indices = @transform_4, window_bounds = array<i64: 1, 128>}, {transform_indices = @transform_5, window_bounds = array<i64: 8, 128>}]} {
    %c0 = arith.constant 0 : index
    %c0_0 = arith.constant 0 : index
    %0 = vector.load %arg1[%c0, %c0_0] : memref<8x32xbf16, #tpu.memory_space<vmem>>, vector<8x32xbf16>
    %c0_1 = arith.constant 0 : index
    %c0_2 = arith.constant 0 : index
    %1 = vector.load %arg2[%c0_1, %c0_2] : memref<64x32xbf16, #tpu.memory_space<vmem>>, vector<64x32xbf16>
    %cst = arith.constant dense<0.000000e+00> : vector<8x64xf32>
    %2 = tpu.matmul %0, %1, %cst {dimension_numbers = #tpu.dot_dimension_numbers<[1], [1], [0], [0], [0, 0, 1, 0], [], []>} : vector<8x32xbf16>, vector<64x32xbf16>, vector<8x64xf32> -> vector<8x64xf32>
    %c0_3 = arith.constant 0 : index
    %c0_4 = arith.constant 0 : index
    %3 = vector.load %arg3[%c0_3, %c0_4] : memref<1x64xf32, #tpu.memory_space<vmem>>, vector<1x64xf32>
    %4 = vector.broadcast %3 : vector<1x64xf32> to vector<8x64xf32>
    %5 = arith.addf %2, %4 : vector<8x64xf32>
    %cst_5 = arith.constant 0.000000e+00 : f32
    %6 = vector.broadcast %cst_5 : f32 to vector<8x64xf32>
    %7 = arith.maximumf %5, %6 : vector<8x64xf32>
    %8 = arith.truncf %7 : vector<8x64xf32> to vector<8x64xbf16>
    %c0_6 = arith.constant 0 : index
    %c0_7 = arith.constant 0 : index
    %9 = vector.load %arg4[%c0_6, %c0_7] : memref<128x64xbf16, #tpu.memory_space<vmem>>, vector<128x64xbf16>
    %cst_8 = arith.constant dense<0.000000e+00> : vector<8x128xf32>
    %10 = tpu.matmul %8, %9, %cst_8 {dimension_numbers = #tpu.dot_dimension_numbers<[1], [1], [0], [0], [0, 0, 1, 0], [], []>} : vector<8x64xbf16>, vector<128x64xbf16>, vector<8x128xf32> -> vector<8x128xf32>
    %c0_9 = arith.constant 0 : index
    %c0_10 = arith.constant 0 : index
    %11 = vector.load %arg5[%c0_9, %c0_10] : memref<1x128xf32, #tpu.memory_space<vmem>>, vector<1x128xf32>
    %12 = vector.broadcast %11 : vector<1x128xf32> to vector<8x128xf32>
    %13 = arith.addf %10, %12 : vector<8x128xf32>
    %c0_11 = arith.constant 0 : index
    %c0_12 = arith.constant 0 : index
    %14 = vector.load %arg6[%c0_11, %c0_12] : memref<8x128xf32, #tpu.memory_space<vmem>>, vector<8x128xf32>
    tpu.vector_store %arg6[%c0_11, %c0_12], %13 {strides = array<i32>} : memref<8x128xf32, #tpu.memory_space<vmem>>, vector<8x128xf32>,
    return
  }
  func.func @transform_0(%arg0: i32) -> (i32, i32) {
    %c0_i32 = arith.constant 0 : i32
    %c0_i32_0 = arith.constant 0 : i32
    return %arg0, %c0_i32 : i32, i32
  }
  func.func @transform_1(%arg0: i32) -> (i32, i32) {
    %c0_i32 = arith.constant 0 : i32
    %c0_i32_0 = arith.constant 0 : i32
    %c0_i32_1 = arith.constant 0 : i32
    return %c0_i32, %c0_i32_0 : i32, i32
  }
  func.func @transform_2(%arg0: i32) -> (i32, i32) {
    %c0_i32 = arith.constant 0 : i32
    %c0_i32_0 = arith.constant 0 : i32
    %c0_i32_1 = arith.constant 0 : i32
    return %c0_i32, %c0_i32_0 : i32, i32
  }
  func.func @transform_3(%arg0: i32) -> (i32, i32) {
    %c0_i32 = arith.constant 0 : i32
    %c0_i32_0 = arith.constant 0 : i32
    %c0_i32_1 = arith.constant 0 : i32
    return %c0_i32, %c0_i32_0 : i32, i32
  }
  func.func @transform_4(%arg0: i32) -> (i32, i32) {
    %c0_i32 = arith.constant 0 : i32
    %c0_i32_0 = arith.constant 0 : i32
    %c0_i32_1 = arith.constant 0 : i32
    return %c0_i32, %c0_i32_0 : i32, i32
  }
  func.func @transform_5(%arg0: i32) -> (i32, i32) {
    %c0_i32 = arith.constant 0 : i32
    %c0_i32_0 = arith.constant 0 : i32
    return %arg0, %c0_i32 : i32, i32
  }
}

</mosaic_0001>

<bundles_post_ra>
// kernel: tpu_custom_call.1
= control target key start
LH: loop header
LB: loop body
LE: loop exit
PB: predicated region body
PF: predicated region fallthrough
CT: control target
= control target key end

     0   :  { %v363_v1 = vmov 0.0   ;;  %vm58_vm0 = vcmask 261120   ;;  %vm364_vm1 = vmmov 0   ;;  %vm179_vm2 = vcmask 523264   ;;  %s467_s0 = inlined_call_operand.vmem [shape: bf16[8,32], index: 0, kind: input, shape index: {}]   ;;  %s468_s1 = inlined_call_operand.vmem [shape: bf16[64,32], index: 1, kind: input, shape index: {}]   ;;  %s469_s2 = inlined_call_operand.vmem [shape: f32[1,64], index: 2, kind: input, shape index: {}]   ;;  %s470_s3 = inlined_call_operand.vmem [shape: bf16[128,64], index: 3, kind: input, shape index: {}]   ;;  %s471_s4 = inlined_call_operand.vmem [shape: f32[1,128], index: 4, kind: input, shape index: {}]   ;;  %s472_s5 = inlined_call_operand.hbm [shape: f32[8,128], index: 5, kind: output, shape index: {}]  }
   0x1   :  { %v327_v0 = vld [vmem:[%s468_s1] sm:$0xff]   ;;  %292 = vmatprep.subr.bf16.mxu0 %v363_v1  ;;  %304 = vmatprep.subr.bf16.mxu1 %v363_v1  ;;  %v328_v3 = vld [vmem:[%s468_s1 + $0x8] sm:$0xff]   ;;  %v329_v8 = vld [vmem:[%s468_s1 + $0x10] sm:$0xff]  }
   0x2   :  { %v63_v2 = vsel %vm58_vm0, %v327_v0, 0  ;;  %300 = vmatprep.mubr.msk.bf16.mxu0 %vm364_vm1, %v363_v1  ;;  %v331_v4 = vld [vmem:[%s470_s3] sm:$0xff]   ;;  %320 = vmatprep.mubr.msk.bf16.mxu1 %vm364_vm1, %v363_v1  ;;  %v66_v5 = vsel %vm58_vm0, %v328_v3, 0  ;;  %v332_v7 = vld [vmem:[%s470_s3 + $0x8] sm:$0xff]  }
   0x3   :  { %293 = vmatpush3.bf16.xpose.msra.mxu0 %v63_v2  ;;  %v184_v6 = vsel %vm179_vm2, %v331_v4, 0  ;;  %v187_v9 = vsel %vm179_vm2, %v332_v7, 0 }
   0x4   :  { %294 = vmatprep.subr.bf16.mxu0 %v363_v1  ;;  %305 = vmatpush3.bf16.xpose.msra.mxu1 %v184_v6 }
   0x5   :  { %306 = vmatprep.subr.bf16.mxu1 %v363_v1 }
   0xb   :  { %295 = vmatpush3.bf16.xpose.msra.mxu0 %v66_v5 }
   0xc   :  { %296 = vmatprep.subr.bf16.mxu0 %v363_v1 }
   0xd   :  { %10 = vsyncpa [#allocation3], 0  ;;  %v69_v10 = vsel %vm58_vm0, %v329_v8, 0  ;;  %307 = vmatpush3.bf16.xpose.msra.mxu1 %v187_v9  ;;  %v333_v11 = vld [vmem:[%s470_s3 + $0x10] sm:$0xff]   ;;  %v330_v12 = vld [vmem:[%s468_s1 + $0x18] sm:$0xff]  }
   0xe   :  { %308 = vmatprep.subr.bf16.mxu1 %v363_v1  ;;  %v190_v13 = vsel %vm179_vm2, %v333_v11, 0  ;;  %v72_v14 = vsel %vm58_vm0, %v330_v12, 0  ;;  %v334_v15 = vld [vmem:[%s470_s3 + $0x18] sm:$0xff]   ;;  %v22_v17 = vld [vmem:[%s467_s0] sm:$0xf]  ;;  %v336_v20 = vld [vmem:[%s470_s3 + $0x28] sm:$0xff]  }
   0xf   :  { %v193_v16 = vsel %vm179_vm2, %v334_v15, 0  ;;  %v335_v18 = vld [vmem:[%s470_s3 + $0x20] sm:$0xff]   ;;  %v199_v21 = vsel %vm179_vm2, %v336_v20, 0  ;;  %v337_v22 = vld [vmem:[%s470_s3 + $0x30] sm:$0xff]   ;;  %v338_v24 = vld [vmem:[%s470_s3 + $0x38] sm:$0xff]   ;;  %s365_s3 = smov [#allocation2]  }
  0x10   :  { %v196_v19 = vsel %vm179_vm2, %v335_v18, 0  ;;  %v202_v23 = vsel %vm179_vm2, %v337_v22, 0  ;;  %v205_v25 = vsel %vm179_vm2, %v338_v24, 0  ;;  %v262_v26 = vld [vmem:[%s469_s2] ss:$0 sm:$0xff]  ;;  %s254_s21 = sshll.u32 %s365_s3, 4  ;;  %s255_s21 = int_to_ptr.vmem [resolvable:$true] %s254_s21 }
  0x11   :  { %v268_v34 = vld [vmem:[%s471_s4] ss:$0 sm:$0xff]  ;;  %s339_s2 = scalar_lea.vmem %s255_s21, 128  ;;  %p344_p1 = scmp.lt.s32.totalorder %s255_s21, %s255_s21 }
  0x12   :  { %p340_p0 = scmp.ne.s32.totalorder %s255_s21, %s339_s2  ;;  %p345_p2 = scmp.lt.s32.totalorder %s339_s2, %s339_s2 }
  0x13   :  { %297 = vmatpush3.bf16.xpose.msra.mxu0 %v69_v10 }
  0x14   :  { %298 = vmatprep.subr.bf16.mxu0 %v363_v1  ;;  %p346_p3 = por %p345_p2, %p344_p1 }
  0x15   :  { %309 = vmatpush3.bf16.xpose.msra.mxu1 %v190_v13 }
  0x16   :  { %310 = vmatprep.subr.bf16.mxu1 %v363_v1  ;;  %p347_p4 = pnand %p346_p3, %p340_p0 }
  0x1b   :  { %299 = vmatpush3.bf16.xpose.msra.mxu0 %v72_v14 }
  0x1d   :  { %311 = vmatpush3.bf16.xpose.msra.mxu1 %v193_v16 }
  0x1e   :  { %312 = vmatprep.subr.bf16.mxu1 %v363_v1 }
  0x22   :  { %301 = vmatmul.mubr.msk.bf16.vlgmr.msra.gmra.mrb[0].mxu0 %vm58_vm0, %v22_v17 }
  0x25   :  { %313 = vmatpush3.bf16.xpose.msra.mxu1 %v196_v19 }
  0x26   :  { %314 = vmatprep.subr.bf16.mxu1 %v363_v1 }
  0x2d   :  { %315 = vmatpush3.bf16.xpose.msra.mxu1 %v199_v21 }
  0x2e   :  { %316 = vmatprep.subr.bf16.mxu1 %v363_v1 }
  0x35   :  { %317 = vmatpush3.bf16.xpose.msra.mxu1 %v202_v23 }
  0x36   :  { %318 = vmatprep.subr.bf16.mxu1 %v363_v1 }
  0x3d   :  { %319 = vmatpush3.bf16.xpose.msra.mxu1 %v205_v25 }
  0xf5   :  { %v108_v27 = vpop.f32.mrb[0].mxu0 }
  0xf6   :  { %v109_v28 = vadd.f32 %v262_v26, %v108_v27  ;;  %v302_v29 = vpop.f32.mrb[1].mxu0 }
  0xf7   :  { %v111_v30 = vpop.f32.mrb[2].mxu0 }
  0xf8   :  { %v114_v31 = vmax.f32 %v109_v28, 0.0  ;;  %v303_v32 = vpop.f32.mrb[3].mxu0 }
  0xfa   :  { %v115_v33 = vpack.c.bf16 %v114_v31, %v114_v31 }
  0xfc   :  { %321 = vmatmul.mubr.msk.bf16.vlgmr.msra.gmra.mrb[0].mxu1 %vm179_vm2, %v115_v33 }
 0x1cf   :  { %v241_v35 = vpop.f32.mrb[0].mxu1 }
 0x1d0   :  { %v242_v36 = vadd.f32 %v268_v34, %v241_v35  ;;  %v322_v37 = vpop.f32.mrb[1].mxu1 }
 0x1d1   :  { %v244_v38 = vpop.f32.mrb[2].mxu1 }
 0x1d2   :  { %247 = vst [vmem:[#allocation2] sm:$0xff] %v242_v36  ;;  %v323_v39 = vpop.f32.mrb[3].mxu1 }
 0x1d3   :  { %350 = shalt.err (!%p347_p4)
}
 0x1d4   :  { %s351_s4 = scalar_lea.hbm %s472_s5, 128 }
 0x1d5   :  { %p352_p5 = scmp.ne.s32.totalorder %s472_s5, %s351_s4  ;;  %p355_p6 = scmp.lt.u32.totalorder %s351_s4, %s472_s5 }
 0x1d7   :  { %p357_p7 = pnand %p355_p6, %p352_p5 }
 0x1d9   :  { %360 = shalt.err (!%p357_p7)
}
 0x1da   :  { %257 = dma.vmem_to_hbm [thread:$0]  %s255_s21, 128, %s472_s5, [#allocation3]  }
 0x1db   :  { %361 = dma.done.wait [#allocation3], 128  }
 0x1dc   :  { %362 = vsyncadd [#allocation3], 4294967168 }
 0x1dd   :  { %261 = vsyncpa [#allocation3], 1 }

</bundles_post_ra>
